<compile_context>
chip_gen: v7x
topology: tpu7x:2x2x1
jax: 0.10.0
libtpu: 0.0.40
codegen_flags: <defaults>
</compile_context>

<pallas_src>
import jax
import jax.numpy as jnp
from jax.experimental import pallas as pl
from jax.experimental.pallas import tpu as pltpu

_LANES = 128


def _cdiv(a, b):
    return -(-a // b)


def _round_up(x, m):
    return _cdiv(x, m) * m


def _log1p_exact(x):
    # Accurate log1p using only ops with guaranteed Mosaic lowerings
    # (Goldberg's trick): matches torch's use of log1p for the (1-p) term.
    w = 1.0 + x
    return jnp.where(w == 1.0, x, jnp.log(w) * (x / (w - 1.0)))


def _make_bce_kernel(*, n_rows, tile_rows, acc_rows, n_cols, blocks_per_split,
                     mask_rows, binary_targets):
    def kernel(p_ref, t_ref, o_ref):
        # Zero the per-split resident accumulator on the first reduction step.
        @pl.when(pl.program_id(1) == 0)
        def _():
            o_ref[...] = jnp.zeros_like(o_ref)

        p = p_ref[...].astype(jnp.float32)
        t = t_ref[...].astype(jnp.float32)

        if binary_targets:
            # Hard {0,1} targets: a single log per element.
            sel = jnp.where(t >= 0.5, p - 1.0, -p)       # log1p(sel) = log(p) or log(1-p)
            loss = -jnp.maximum(_log1p_exact(sel), -100.0)
        else:
            # General (possibly soft) targets — PyTorch semantics.
            log_p = jnp.maximum(jnp.log(p), -100.0)
            log_1mp = jnp.maximum(_log1p_exact(-p), -100.0)
            loss = -(t * log_p + (1.0 - t) * log_1mp)

        if mask_rows:
            # Only the final global block is partial; zero its out-of-range rows
            # (cheap VPU cmp+select on an HBM-bound kernel, no HBM padding copy).
            gb = pl.program_id(0) * blocks_per_split + pl.program_id(1)
            row0 = gb * tile_rows
            rows = jax.lax.broadcasted_iota(jnp.int32, loss.shape, 0) + row0
            loss = jnp.where(rows < n_rows, loss, 0.0)

        if acc_rows > 1:
            # Fold (tile_rows, C) into the (8, C) accumulator with elementwise
            # vreg adds only (no per-step cross-lane reduce).
            o_ref[...] += loss.reshape(1, tile_rows // acc_rows, acc_rows, n_cols).sum(axis=1)
        else:
            # Tiny single-block fallback (tile_rows not a multiple of 8).
            o_ref[...] += loss.sum(axis=0, keepdims=True)[None]

    return kernel


def binary_cross_entropy_p(pred_y, true_y, *, binary_targets=False, _tile_rows_cap=None):
    """Pallas implementation of BinaryCrossEntropyP().forward for the default
    (plain 'bce', eval / no-sampling) code path: mean BCE over all elements."""
    assert pred_y.shape == true_y.shape
    n_elems = int(pred_y.size)
    assert n_elems > 0

    ip = jnp.dtype(pred_y.dtype).itemsize
    it = jnp.dtype(true_y.dtype).itemsize
    pack = 8 * (4 // min(ip, it, 4))          # sublane packing: 8 f32, 16 bf16, 32 int8

    # ---- generation-aware block sizing --------------------------------------
    try:
        info = pltpu.get_tpu_info()
        vmem_bytes = int(getattr(info, "vmem_capacity_bytes", 64 << 20))
    except Exception:
        vmem_bytes = 64 << 20
    if vmem_bytes >= (96 << 20):              # v5e / v6e: 128 MiB VMEM per TC
        block_bytes = 4 << 20                 # per input
        vmem_limit = 64 << 20
    else:                                     # v7x: 64 MiB VMEM per TC
        block_bytes = 2 << 20
        vmem_limit = 32 << 20

    # ---- copy-free 2-D view of the inputs ------------------------------------
    if n_elems % _LANES == 0:
        n_cols = _LANES                       # lane-dense slab (free contiguous reshape)
        p2 = pred_y.reshape(-1, _LANES)
        t2 = true_y.reshape(-1, _LANES)
    else:
        # Ragged: keep the natural last dim as lanes (no HBM copy); the partial
        # last row-block is masked in-kernel instead of padding.
        n_cols = pred_y.shape[-1] if pred_y.ndim >= 2 else n_elems
        p2 = pred_y.reshape(-1, n_cols)
        t2 = true_y.reshape(-1, n_cols)
        if n_cols * (ip + it) > 2 * block_bytes:
            # TODO(synk): extremely wide ragged rows — fall back to a padded
            # lane-dense layout (one extra HBM copy; rare shape). Pad value
            # (p=1, t=1) contributes exactly zero loss.
            n_pad = _round_up(n_elems, _LANES) - n_elems
            p2 = jnp.pad(pred_y.reshape(-1), (0, n_pad), constant_values=1).reshape(-1, _LANES)
            t2 = jnp.pad(true_y.reshape(-1), (0, n_pad), constant_values=1).reshape(-1, _LANES)
            n_cols = _LANES
    n_rows = p2.shape[0]

    # ---- row tiling -----------------------------------------------------------
    tile_rows = (2 * block_bytes) // (n_cols * (ip + it))
    tile_rows = max(pack, (tile_rows // pack) * pack)
    if _tile_rows_cap is not None:            # test hook: force multi-block grids
        tile_rows = min(tile_rows, max(pack, (_tile_rows_cap // pack) * pack))
    if tile_rows >= n_rows:
        tile_rows = n_rows                    # full-extent block (always legal)
    n_blocks = _cdiv(n_rows, tile_rows)

    # 2-way split shards the reduction over both TensorCores on v7x; only taken
    # when the block count divides evenly so single-TC chips pay nothing.
    n_splits = 2 if (n_blocks >= 2 and n_blocks % 2 == 0) else 1
    blocks_per_split = n_blocks // n_splits

    acc_rows = 8 if tile_rows % 8 == 0 else 1
    mask_rows = (n_rows % tile_rows) != 0

    kernel = _make_bce_kernel(
        n_rows=n_rows, tile_rows=tile_rows, acc_rows=acc_rows, n_cols=n_cols,
        blocks_per_split=blocks_per_split, mask_rows=mask_rows,
        binary_targets=binary_targets)

    in_map = lambda s, i: (s * blocks_per_split + i, 0)

    partials = pl.pallas_call(
        kernel,
        out_shape=jax.ShapeDtypeStruct((n_splits, acc_rows, n_cols), jnp.float32),
        grid_spec=pltpu.PrefetchScalarGridSpec(
            num_scalar_prefetch=0,
            grid=(n_splits, blocks_per_split),
            in_specs=[
                pl.BlockSpec((tile_rows, n_cols), in_map),
                pl.BlockSpec((tile_rows, n_cols), in_map),
            ],
            out_specs=pl.BlockSpec((1, acc_rows, n_cols), lambda s, i: (s, 0, 0)),
        ),
        compiler_params=pltpu.CompilerParams(
            dimension_semantics=("parallel", "arbitrary"),
            vmem_limit_bytes=vmem_limit,
        ),
    )(p2, t2)

    # Single epilogue reduce + mean over the *original* element count.
    return partials.sum() / n_elems


def _reference_bce_mean(pred_y, true_y):
    p = pred_y.astype(jnp.float32)
    t = true_y.astype(jnp.float32)
    log_p = jnp.maximum(jnp.log(p), -100.0)
    log_1mp = jnp.maximum(jnp.log1p(-p), -100.0)
    return jnp.mean(-(t * log_p + (1.0 - t) * log_1mp))


if __name__ == "__main__":
    key = jax.random.PRNGKey(0)
    k1, k2, k3, k4, k5, k6 = jax.random.split(key, 6)

    # (batch, num_labels): the multilabel layout this loss module is used with.
    B, K = 16, 128
    pred = jax.random.uniform(k1, (B, K), jnp.float32, minval=1e-4, maxval=1.0 - 1e-4)
    true = jax.random.bernoulli(k2, p=0.3, shape=(B, K)).astype(jnp.float32)
    loss = jax.block_until_ready(binary_cross_entropy_p(pred, true))
    ref = _reference_bce_mean(pred, true)
    assert jnp.allclose(loss, ref, rtol=1e-5, atol=1e-6), (loss, ref)

    # Binary-target fast path (single log per element) on the same hard labels.
    loss_b = jax.block_until_ready(binary_cross_entropy_p(pred, true, binary_targets=True))
    assert jnp.allclose(loss_b, ref, rtol=1e-5, atol=1e-6), (loss_b, ref)

    # Ragged shape (numel not a multiple of 128): natural-lane path, no padding.
    B2, K2 = 7, 100
    pred2 = jax.random.uniform(k3, (B2, K2), jnp.float32, minval=1e-4, maxval=1.0 - 1e-4)
    true2 = jax.random.bernoulli(k4, p=0.3, shape=(B2, K2)).astype(jnp.float32)
    loss2 = jax.block_until_ready(binary_cross_entropy_p(pred2, true2))
    ref2 = _reference_bce_mean(pred2, true2)
    assert jnp.allclose(loss2, ref2, rtol=1e-5, atol=1e-6), (loss2, ref2)

    # Multi-block grid with a partial (masked) last block and 2-way split
    # (small tile cap only to exercise the path at demo sizes).
    B3, K3 = 100, 128
    pred3 = jax.random.uniform(k5, (B3, K3), jnp.float32, minval=1e-4, maxval=1.0 - 1e-4)
    true3 = jax.random.bernoulli(k6, p=0.3, shape=(B3, K3)).astype(jnp.float32)
    loss3 = jax.block_until_ready(binary_cross_entropy_p(pred3, true3, _tile_rows_cap=32))
    ref3 = _reference_bce_mean(pred3, true3)
    assert jnp.allclose(loss3, ref3, rtol=1e-5, atol=1e-6), (loss3, ref3)

    # TODO(synk): training-only branches (negative sampling via Categorical,
    # use_sampling, batch-weighted BCE, rescale_freq) and is_mtk multi-output
    # masking are data-dependent host-side logic and are not part of this kernel.
    print("KERNEL_OK")
</pallas_src>

<mosaic_0001>
module attributes {stable_mosaic.version = 11 : i64} {
  func.func @kernel(%arg0: i32, %arg1: i32, %arg2: memref<16x128xf32, #tpu.memory_space<vmem>>, %arg3: memref<16x128xf32, #tpu.memory_space<vmem>>, %arg4: memref<1x8x128xf32, #tpu.memory_space<vmem>>) attributes {dimension_semantics = [#tpu.dimension_semantics<parallel>, #tpu.dimension_semantics<arbitrary>], iteration_bounds = array<i64: 1, 1>, scalar_prefetch = 0 : i64, scratch_operands = 0 : i64, tpu.core_type = #tpu.core_type<tc>, window_params = [{transform_indices = @transform_0, window_bounds = array<i64: 16, 128>}, {transform_indices = @transform_1, window_bounds = array<i64: 16, 128>}, {transform_indices = @transform_2, window_bounds = array<i64: 1, 8, 128>}]} {
    %c0_i32 = arith.constant 0 : i32
    %0 = arith.cmpi eq, %arg1, %c0_i32 : i32
    %1 = arith.extui %0 : i1 to i32
    %c0_i32_0 = arith.constant 0 : i32
    %2 = arith.cmpi ne, %1, %c0_i32_0 : i32
    scf.if %2 {
      %cst_18 = arith.constant 0.000000e+00 : f32
      %34 = vector.broadcast %cst_18 : f32 to vector<1x8x128xf32>
      %c0_19 = arith.constant 0 : index
      %c0_20 = arith.constant 0 : index
      %c0_21 = arith.constant 0 : index
      %35 = vector.load %arg4[%c0_19, %c0_20, %c0_21] : memref<1x8x128xf32, #tpu.memory_space<vmem>>, vector<1x8x128xf32>
      tpu.vector_store %arg4[%c0_19, %c0_20, %c0_21], %34 {strides = array<i32>} : memref<1x8x128xf32, #tpu.memory_space<vmem>>, vector<1x8x128xf32>,
    } else {
    }
    %c0 = arith.constant 0 : index
    %c0_1 = arith.constant 0 : index
    %3 = vector.load %arg2[%c0, %c0_1] : memref<16x128xf32, #tpu.memory_space<vmem>>, vector<16x128xf32>
    %c0_2 = arith.constant 0 : index
    %c0_3 = arith.constant 0 : index
    %4 = vector.load %arg3[%c0_2, %c0_3] : memref<16x128xf32, #tpu.memory_space<vmem>>, vector<16x128xf32>
    %5 = math.log %3 : vector<16x128xf32>
    %cst = arith.constant -1.000000e+02 : f32
    %6 = vector.broadcast %cst : f32 to vector<16x128xf32>
    %7 = arith.maximumf %5, %6 : vector<16x128xf32>
    %cst_4 = arith.constant 0.000000e+00 : f32
    %8 = vector.broadcast %cst_4 : f32 to vector<16x128xf32>
    %9 = arith.subf %8, %3 : vector<16x128xf32>
    %cst_5 = arith.constant 1.000000e+00 : f32
    %10 = vector.broadcast %cst_5 : f32 to vector<16x128xf32>
    %11 = arith.addf %10, %9 : vector<16x128xf32>
    %cst_6 = arith.constant 1.000000e+00 : f32
    %12 = vector.broadcast %cst_6 : f32 to vector<16x128xf32>
    %13 = arith.cmpf oeq, %11, %12 : vector<16x128xf32>
    %14 = math.log %11 : vector<16x128xf32>
    %cst_7 = arith.constant 1.000000e+00 : f32
    %15 = vector.broadcast %cst_7 : f32 to vector<16x128xf32>
    %16 = arith.subf %11, %15 : vector<16x128xf32>
    %17 = arith.divf %9, %16 : vector<16x128xf32>
    %18 = arith.mulf %14, %17 : vector<16x128xf32>
    %19 = arith.select %13, %9, %18 : vector<16x128xi1>, vector<16x128xf32>
    %cst_8 = arith.constant -1.000000e+02 : f32
    %20 = vector.broadcast %cst_8 : f32 to vector<16x128xf32>
    %21 = arith.maximumf %19, %20 : vector<16x128xf32>
    %22 = arith.mulf %4, %7 : vector<16x128xf32>
    %cst_9 = arith.constant 1.000000e+00 : f32
    %23 = vector.broadcast %cst_9 : f32 to vector<16x128xf32>
    %24 = arith.subf %23, %4 : vector<16x128xf32>
    %25 = arith.mulf %24, %21 : vector<16x128xf32>
    %26 = arith.addf %22, %25 : vector<16x128xf32>
    %cst_10 = arith.constant 0.000000e+00 : f32
    %27 = vector.broadcast %cst_10 : f32 to vector<16x128xf32>
    %28 = arith.subf %27, %26 : vector<16x128xf32>
    %c0_11 = arith.constant 0 : index
    %c0_12 = arith.constant 0 : index
    %c0_13 = arith.constant 0 : index
    %29 = vector.load %arg4[%c0_11, %c0_12, %c0_13] : memref<1x8x128xf32, #tpu.memory_space<vmem>>, vector<1x8x128xf32>
    %30 = vector.shape_cast %28 : vector<16x128xf32> to vector<1x2x8x128xf32>
    %cst_14 = arith.constant dense<0.000000e+00> : vector<1x8x128xf32>
    %31 = vector.multi_reduction <add>, %30, %cst_14 [1] : vector<1x2x8x128xf32> to vector<1x8x128xf32>
    %32 = arith.addf %29, %31 : vector<1x8x128xf32>
    %c0_15 = arith.constant 0 : index
    %c0_16 = arith.constant 0 : index
    %c0_17 = arith.constant 0 : index
    %33 = vector.load %arg4[%c0_15, %c0_16, %c0_17] : memref<1x8x128xf32, #tpu.memory_space<vmem>>, vector<1x8x128xf32>
    tpu.vector_store %arg4[%c0_15, %c0_16, %c0_17], %32 {strides = array<i32>} : memref<1x8x128xf32, #tpu.memory_space<vmem>>, vector<1x8x128xf32>,
    return
  }
  func.func @transform_0(%arg0: i32, %arg1: i32) -> (i32, i32) {
    %c1_i32 = arith.constant 1 : i32
    %0 = arith.muli %arg0, %c1_i32 : i32
    %1 = arith.addi %0, %arg1 : i32
    %c0_i32 = arith.constant 0 : i32
    %c0_i32_0 = arith.constant 0 : i32
    return %1, %c0_i32 : i32, i32
  }
  func.func @transform_1(%arg0: i32, %arg1: i32) -> (i32, i32) {
    %c1_i32 = arith.constant 1 : i32
    %0 = arith.muli %arg0, %c1_i32 : i32
    %1 = arith.addi %0, %arg1 : i32
    %c0_i32 = arith.constant 0 : i32
    %c0_i32_0 = arith.constant 0 : i32
    return %1, %c0_i32 : i32, i32
  }
  func.func @transform_2(%arg0: i32, %arg1: i32) -> (i32, i32, i32) {
    %c0_i32 = arith.constant 0 : i32
    %c0_i32_0 = arith.constant 0 : i32
    %c0_i32_1 = arith.constant 0 : i32
    return %arg0, %c0_i32, %c0_i32_0 : i32, i32, i32
  }
}

</mosaic_0001>

<bundles_post_ra>
// kernel: tpu_custom_call.1
= control target key start
LH: loop header
LB: loop body
LE: loop exit
PB: predicated region body
PF: predicated region fallthrough
CT: control target
= control target key end

     0   :  { %7 = vsyncpa [#allocation3], 0  ;;  %s267_s0 = inlined_call_operand.hbm [shape: f32[16,128], index: 0, kind: input, shape index: {}]   ;;  %s268_s1 = inlined_call_operand.hbm [shape: f32[16,128], index: 1, kind: input, shape index: {}]   ;;  %s269_s2 = inlined_call_operand.hbm [shape: f32[1,8,128], index: 2, kind: output, shape index: {}]  }
   0x1   :  { %8 = vsyncpa [#allocation6], 0 }
   0x2   :  { %9 = vsyncpa [#allocation4], 0  ;;  %s211_s9 = smov [#allocation2]   ;;  %s139_s13 = scalar_lea.hbm %s267_s0, 256 }
   0x3   :  { %s19_s10 = sshll.u32 %s211_s9, 4  ;;  %p140_p0 = scmp.ne.s32.totalorder %s267_s0, %s139_s13  ;;  %s20_s10 = int_to_ptr.vmem [resolvable:$true] %s19_s10 }
   0x4   :  { %p143_p1 = scmp.lt.u32.totalorder %s139_s13, %s267_s0 }
   0x6   :  { %p145_p2 = pnand %p143_p1, %p140_p0 }
   0x8   :  { %148 = shalt.err (!%p145_p2)
}
   0x9   :  { %s149_s18 = scalar_lea.vmem %s20_s10, 256  ;;  %p154_p4 = scmp.lt.s32.totalorder %s20_s10, %s20_s10 }
   0xa   :  { %p150_p3 = scmp.ne.s32.totalorder %s20_s10, %s149_s18  ;;  %p155_p5 = scmp.lt.s32.totalorder %s149_s18, %s149_s18 }
   0xc   :  { %p156_p6 = por %p155_p5, %p154_p4 }
   0xe   :  { %p157_p7 = pnand %p156_p6, %p150_p3 }
  0x10   :  { %160 = shalt.err (!%p157_p7)
}
  0x11   :  { %s212_s19 = smov 128   ;;  %s213_s20 = smov 8  }
  0x12   :  { %25 = dma.hbm_to_vmem [thread:$0]  %s267_s0, 256, %s20_s10, [#allocation3], %s212_s19, %s212_s19, %s213_s20  }
  0x13   :  { %s214_s23 = smov [#allocation5]   ;;  %s161_s27 = scalar_lea.hbm %s268_s1, 256 }
  0x14   :  { %s35_s24 = sshll.u32 %s214_s23, 4  ;;  %p162_p8 = scmp.ne.s32.totalorder %s268_s1, %s161_s27  ;;  %s36_s24 = int_to_ptr.vmem [resolvable:$true] %s35_s24 }
  0x15   :  { %p165_p9 = scmp.lt.u32.totalorder %s161_s27, %s268_s1 }
  0x17   :  { %p167_p10 = pnand %p165_p9, %p162_p8 }
  0x19   :  { %170 = shalt.err (!%p167_p10)
}
  0x1a   :  { %s171_s4 = scalar_lea.vmem %s36_s24, 256  ;;  %p176_p12 = scmp.lt.s32.totalorder %s36_s24, %s36_s24 }
  0x1b   :  { %p172_p11 = scmp.ne.s32.totalorder %s36_s24, %s171_s4  ;;  %p177_p13 = scmp.lt.s32.totalorder %s171_s4, %s171_s4 }
  0x1d   :  { %p178_p0 = por %p177_p13, %p176_p12 }
  0x1f   :  { %p179_p1 = pnand %p178_p0, %p172_p11 }
  0x21   :  { %182 = shalt.err (!%p179_p1)
}
  0x22   :  { %41 = dma.hbm_to_vmem [thread:$0]  %s268_s1, 256, %s36_s24, [#allocation6], %s212_s19, %s212_s19, %s213_s20  }
  0x23   :  { %205 = dma.done.wait [#allocation3], 256  }
  0x24   :  { %206 = vsyncadd [#allocation3], 4294967040 }
  0x25   :  { %207 = dma.done.wait [#allocation6], 256  }
  0x26   :  { %208 = vsyncadd [#allocation6], 4294967040  ;;  %v57_v0 = vld [vmem:[#allocation2] sm:$0xff]  ;;  %v58_v1 = vld [vmem:[#allocation2 + $0x8] sm:$0xff]  ;;  %s215_s1 = smov [#allocation7]  }
  0x27   :  { %v67_v2 = vsub.f32 0.0, %v57_v0  ;;  %v68_v3 = vsub.f32 0.0, %v58_v1  ;;  %127 = vlog2.f32 %v57_v0  ;;  %v59_v18 = vld [vmem:[#allocation5] sm:$0xff]  ;;  %v60_v20 = vld [vmem:[#allocation5 + $0x8] sm:$0xff]  ;;  %s109_s6 = sshll.u32 %s215_s1, 4  ;;  %s110_s6 = int_to_ptr.vmem [resolvable:$true] %s109_s6 }
  0x28   :  { %129 = vlog2.f32 %v58_v1  ;;  %v91_v26 = vsub.f32 1.0, %v59_v18  ;;  %v92_v28 = vsub.f32 1.0, %v60_v20  ;;  %s183_s7 = scalar_lea.vmem %s110_s6, 128  ;;  %p188_p3 = scmp.lt.s32.totalorder %s110_s6, %s110_s6 }
  0x29   :  { %v69_v4 = vadd.f32 1.0, %v67_v2  ;;  %v70_v5 = vadd.f32 1.0, %v68_v3  ;;  %p184_p2 = scmp.ne.s32.totalorder %s110_s6, %s183_s7  ;;  %p189_p4 = scmp.lt.s32.totalorder %s183_s7, %s183_s7 }
  0x2b   :  { %131 = vlog2.f32 %v69_v4  ;;  %v119_v6 = vadd.f32 -1.0, %v69_v4  ;;  %v120_v7 = vadd.f32 -1.0, %v70_v5  ;;  %vm71_vm0 = vcmp.eq.f32.partialorder %v69_v4, 1.0  ;;  %p190_p5 = por %p189_p4, %p188_p3 }
  0x2c   :  { %133 = vlog2.f32 %v70_v5  ;;  %vm72_vm1 = vcmp.eq.f32.partialorder %v70_v5, 1.0 }
  0x2d   :  { %135 = vrcp.f32 %v119_v6  ;;  %p191_p6 = pnand %p190_p5, %p184_p2 }
  0x2e   :  { %137 = vrcp.f32 %v120_v7 }
  0x31   :  { %v128_v8 = vpop.eup %127 }
  0x32   :  { %v130_v9 = vpop.eup %129  ;;  %v62_v11 = vmul.f32 0.6931472, %v128_v8 }
  0x33   :  { %v64_v13 = vmul.f32 0.6931472, %v130_v9 }
  0x34   :  { %v65_v21 = vmax.f32 %v62_v11, -100.0 }
  0x35   :  { %v132_v10 = vpop.eup %131  ;;  %v66_v23 = vmax.f32 %v64_v13, -100.0 }
  0x36   :  { %v134_v12 = vpop.eup %133  ;;  %v74_v14 = vmul.f32 0.6931472, %v132_v10  ;;  %v89_v31 = vmul.f32 %v65_v21, %v59_v18 }
  0x37   :  { %v136_v15 = vpop.eup %135  ;;  %v76_v16 = vmul.f32 0.6931472, %v134_v12  ;;  %v90_v33 = vmul.f32 %v66_v23, %v60_v20 }
  0x38   :  { %v138_v17 = vpop.eup %137  ;;  %v80_v19 = vmul.f32 %v136_v15, %v67_v2 }
  0x39   :  { %v82_v22 = vmul.f32 %v138_v17, %v68_v3 }
  0x3a   :  { %v83_v24 = vmul.f32 %v80_v19, %v74_v14 }
  0x3b   :  { %v84_v25 = vmul.f32 %v82_v22, %v76_v16 }
  0x3c   :  { %v85_v27 = vsel %vm71_vm0, %v67_v2, %v83_v24 }
  0x3d   :  { %v86_v29 = vsel %vm72_vm1, %v68_v3, %v84_v25  ;;  %v87_v30 = vmax.f32 %v85_v27, -100.0 }
  0x3e   :  { %v88_v32 = vmax.f32 %v86_v29, -100.0 }
  0x3f   :  { %v93_v34 = vmul.f32 %v91_v26, %v87_v30 }
  0x40   :  { %v94_v35 = vmul.f32 %v92_v28, %v88_v32 }
  0x41   :  { %v95_v36 = vadd.f32 %v93_v34, %v89_v31 }
  0x42   :  { %v96_v37 = vadd.f32 %v94_v35, %v90_v33 }
  0x43   :  { %v97_v38 = vsub.f32 0.0, %v95_v36 }
  0x44   :  { %v98_v39 = vsub.f32 0.0, %v96_v37 }
  0x46   :  { %v100_v40 = vadd.f32 %v98_v39, %v97_v38 }
  0x48   :  { %102 = vst [vmem:[#allocation7] sm:$0xff] %v100_v40 }
  0x49   :  { %194 = shalt.err (!%p191_p6)
}
  0x4a   :  { %s195_s10 = scalar_lea.hbm %s269_s2, 128 }
  0x4b   :  { %p196_p7 = scmp.ne.s32.totalorder %s269_s2, %s195_s10  ;;  %p199_p8 = scmp.lt.u32.totalorder %s195_s10, %s269_s2 }
  0x4d   :  { %p201_p9 = pnand %p199_p8, %p196_p7 }
  0x4f   :  { %204 = shalt.err (!%p201_p9)
}
  0x50   :  { %112 = dma.vmem_to_hbm [thread:$0]  %s110_s6, 128, %s269_s2, [#allocation4]  }
  0x51   :  { %209 = dma.done.wait [#allocation4], 128  }
  0x52   :  { %210 = vsyncadd [#allocation4], 4294967168 }
  0x53   :  { %116 = vsyncpa [#allocation3], 1 }
  0x54   :  { %117 = vsyncpa [#allocation6], 1 }
  0x55   :  { %118 = vsyncpa [#allocation4], 1 }

</bundles_post_ra>
